<compile_context>
chip_gen: v7x
topology: tpu7x:2x2x1
jax: 0.10.0
libtpu: 0.0.40
codegen_flags: <defaults>
</compile_context>

<pallas_src>
from functools import partial

import numpy as np
import jax
import jax.numpy as jnp
from jax.experimental import pallas as pl
from jax.experimental.pallas import tpu as pltpu


# ----------------------------------------------------------------------------- kernel

def _cutouts_group_kernel(x_ref, ay_ref, axt_ref, o_ref, *, G, cs, NC, Wp):
    """One grid step = one group of G cutouts.

    x_ref  : (Hp, NC*Wp)      bf16, padded image, resident across the whole grid
    ay_ref : (1, G*cs, Hp)    bf16, stacked row-pooling matrices for the group
    axt_ref: (1, Wp, G*cs)    bf16, lane-dense column-pooling matrices
                              (cutout kl occupies columns [kl*cs, (kl+1)*cs))
    o_ref  : (1, cs*NC, G*cs) f32,  o[0, i*NC+nc, kl*cs+j] = cutout_kl[nc, i, j]
    """
    x = x_ref[...]                       # (Hp, NC*Wp)   bf16
    ay = ay_ref[0]                       # (G*cs, Hp)    bf16

    # Phase 1: row pooling for all G cutouts in one lane-dense MXU matmul; the
    # bf16 cast of the intermediate is hoisted out of the per-cutout loop.
    t = jnp.dot(ay, x, preferred_element_type=jnp.float32).astype(jnp.bfloat16)

    # Phase 2: per-cutout column pooling. Each (cs*NC, cs) result is stored
    # directly into its lane band of the output block (no concatenate, bounded
    # live ranges). Wp is a multiple of 128, so the reshape splits whole vreg
    # lane tiles instead of shuffling lanes.
    for k in range(G):
        tk = t[k * cs:(k + 1) * cs, :].reshape(cs * NC, Wp)      # (cs*NC, Wp) bf16
        axk = axt_ref[0, :, k * cs:(k + 1) * cs]                 # (Wp, cs)    bf16
        o_ref[0, :, k * cs:(k + 1) * cs] = jnp.dot(
            tk, axk, preferred_element_type=jnp.float32)


# ----------------------------------------------------------------------------- helpers

def _ceil_to(v, m):
    return ((v + m - 1) // m) * m


def _padded_block_bytes(shape, itemsize):
    """Conservative VMEM footprint of one buffer of a block (minor dim padded to
    128 lanes, second-minor to the dtype's sublane tile)."""
    s = list(shape)
    if len(s) == 1:
        s = [1] + s
    sub = 8 * (4 // itemsize)            # 8 rows for f32, 16 for bf16
    s[-1] = _ceil_to(s[-1], 128)
    s[-2] = _ceil_to(s[-2], sub)
    n = 1
    for d in s:
        n *= d
    return n * itemsize


def _choose_group_size(cutn, cs):
    """Pick cutouts-per-grid-step G so that ngroups = cutn // G >= 2 (megacore
    sharding + DMA/compute pipelining).  Prefer a lane-dense output (G*cs a
    multiple of 128); otherwise prefer even ngroups and a wider output band."""
    if cutn < 2:
        return cutn
    divs = [g for g in range(1, cutn) if cutn % g == 0 and cutn // g >= 2]
    dense = [g for g in divs if (g * cs) % 128 == 0]
    if dense:
        return min(dense)                # lane-dense output, most groups
    return max(divs, key=lambda g: ((cutn // g) % 2 == 0, g))


def _vmem_budget(Hp, Wp, NC, G, cs, x_buffers):
    """Scoped-VMEM limit derived from the actual block sizes, capped at ~0.85x of
    this generation's physical VMEM (v7x: 64 MiB per TensorCore)."""
    need = (
        x_buffers * _padded_block_bytes((Hp, NC * Wp), 2)        # resident image
        + 2 * _padded_block_bytes((1, G * cs, Hp), 2)            # ay (double-buffered)
        + 2 * _padded_block_bytes((1, Wp, G * cs), 2)            # axT (double-buffered)
        + 2 * _padded_block_bytes((1, cs * NC, G * cs), 4)       # out (double-buffered)
        + _padded_block_bytes((G * cs, NC * Wp), 4)              # phase-1 f32 result
        + _padded_block_bytes((G * cs, NC * Wp), 2)              # phase-1 bf16 copy
        + (8 << 20)                                              # headroom
    )
    cap = None
    try:
        cap = getattr(pltpu.get_tpu_info(), "vmem_capacity_bytes", None)
    except Exception:
        cap = None
    if not cap:
        cap = 64 << 20                   # conservative: v7x per-core VMEM
    return int(min(int(0.85 * cap), max(32 << 20, need)))


def _sample_and_build(key, cutn, cs, cut_pow, sideY, sideX, Hp, Wp):
    """Device-side sampling + fused crop/pool matrix construction (no host sync).
    (torch RNG is not bit-reproducible; distributionally identical.)"""
    k1, k2, k3 = jax.random.split(key, 3)
    max_size = min(sideX, sideY)
    min_size = min(sideX, sideY, cs)

    u = jax.random.uniform(k1, (cutn,), dtype=jnp.float32)
    sizes = (u ** cut_pow * (max_size - min_size) + min_size).astype(jnp.int32)
    sizes = jnp.clip(sizes, min_size, max_size)
    ux = jax.random.uniform(k2, (cutn,), dtype=jnp.float32)
    uy = jax.random.uniform(k3, (cutn,), dtype=jnp.float32)
    offx = jnp.floor(ux * (sideX - sizes + 1).astype(jnp.float32)).astype(jnp.int32)
    offy = jnp.floor(uy * (sideY - sizes + 1).astype(jnp.float32)).astype(jnp.int32)

    def pool(full_p, off):
        # A[k, i, p] = 1/len(bin_i) for p in [off_k + floor(i*size_k/cs),
        #                                     off_k + ceil((i+1)*size_k/cs)), else 0.
        i = jnp.arange(cs, dtype=jnp.int32)
        start = off[:, None] + (i[None, :] * sizes[:, None]) // cs                 # (cutn, cs)
        end = off[:, None] + ((i[None, :] + 1) * sizes[:, None] + cs - 1) // cs    # ceil
        w = 1.0 / (end - start).astype(jnp.float32)
        pos = jax.lax.broadcasted_iota(jnp.int32, (cutn, cs, full_p), 2)
        mask = (pos >= start[:, :, None]) & (pos < end[:, :, None])
        return jnp.where(mask, w[:, :, None], 0.0)                                 # (cutn, cs, full_p)

    ay = pool(Hp, offy)                                   # (cutn, cs, Hp)
    axT = jnp.transpose(pool(Wp, offx), (0, 2, 1))        # (cutn, Wp, cs)
    return ay, axT, sizes, offy, offx


# ----------------------------------------------------------------------------- module

class MakeCutouts:
    def __init__(self, cut_size, cutn, cut_pow=1.0):
        self.cut_size = int(cut_size)
        self.cutn = int(cutn)
        self.cut_pow = float(cut_pow)
        self._use_buffered = None        # resolved on first call (pl.Buffered(1) probe)

    def _run_pallas(self, x_t, ay_d, axT_d, Hp, Wp, NC, G, cs, ngroups):
        def attempt(use_buffered):
            if use_buffered:
                # Resident image block (constant index_map): single-buffered.
                x_spec = pl.BlockSpec((Hp, NC * Wp), lambda g: (0, 0),
                                      pipeline_mode=pl.Buffered(1))
            else:
                x_spec = pl.BlockSpec((Hp, NC * Wp), lambda g: (0, 0))
            kern = partial(_cutouts_group_kernel, G=G, cs=cs, NC=NC, Wp=Wp)
            return pl.pallas_call(
                kern,
                out_shape=jax.ShapeDtypeStruct((ngroups, cs * NC, G * cs), jnp.float32),
                grid=(ngroups,),
                in_specs=[
                    x_spec,
                    pl.BlockSpec((1, G * cs, Hp), lambda g: (g, 0, 0)),
                    pl.BlockSpec((1, Wp, G * cs), lambda g: (g, 0, 0)),
                ],
                out_specs=pl.BlockSpec((1, cs * NC, G * cs), lambda g: (g, 0, 0)),
                compiler_params=pltpu.CompilerParams(
                    dimension_semantics=("parallel",),
                    vmem_limit_bytes=_vmem_budget(
                        Hp, Wp, NC, G, cs, x_buffers=1 if use_buffered else 2)),
            )(x_t, ay_d, axT_d)

        probing = self._use_buffered is None
        variants = [True, False] if probing else [self._use_buffered]
        last_err = None
        for use_buffered in variants:
            try:
                out = attempt(use_buffered)
                if probing:
                    out = jax.block_until_ready(out)     # surface compile/run errors here
                self._use_buffered = use_buffered
                return out
            except Exception as e:   # pl.Buffered(1) unsupported -> double-buffered fallback
                last_err = e
        raise last_err

    def __call__(self, x, key):
        # x: (N, C, H, W) float32
        N, C, sideY, sideX = x.shape
        cs, cutn = self.cut_size, self.cutn
        NC = N * C
        Hp = _ceil_to(max(sideY, 8), 8)          # sublane-aligned rows
        Wp = _ceil_to(max(sideX, 128), 128)      # 128-aligned lanes -> cheap kernel reshape
        G = _choose_group_size(cutn, cs)
        ngroups = cutn // G

        # --- device-side sampling + pooling matrices (vectorized, no host sync).
        ay, axT, sizes, offy, offx = _sample_and_build(
            key, cutn, cs, self.cut_pow, sideY, sideX, Hp, Wp)
        # pack: ay -> (ngroups, G*cs, Hp);  axT -> lane-dense (ngroups, Wp, G*cs)
        # bf16 operands: adaptive-bin weights no longer sum to exactly 1; fine at
        # bf16-level tolerance (keep f32 LHS if tighter accuracy is ever needed).
        ay_d = ay.reshape(ngroups, G * cs, Hp).astype(jnp.bfloat16)
        axT_d = axT.reshape(ngroups, G, Wp, cs).transpose(0, 2, 1, 3)
        axT_d = axT_d.reshape(ngroups, Wp, G * cs).astype(jnp.bfloat16)

        # --- pad + pre-transpose image: x_t[h, nc*Wp + w] = x[nc, h, w], bf16.
        x3 = x.reshape(NC, sideY, sideX)
        x3 = jnp.pad(x3, ((0, 0), (0, Hp - sideY), (0, Wp - sideX)))
        x_t = jnp.transpose(x3, (1, 0, 2)).reshape(Hp, NC * Wp).astype(jnp.bfloat16)

        # TODO(synk): for large images with small cutouts, scalar-prefetch
        # (offy, sizes) via PrefetchScalarGridSpec and DMA only an 8x128-aligned
        # superset of each group's crop rows (matmul-1 K and HBM bytes then scale
        # with cutout size), and tile NC when the image block exceeds v7x VMEM.
        out_raw = self._run_pallas(x_t, ay_d, axT_d, Hp, Wp, NC, G, cs, ngroups)

        # (ngroups, cs*NC, G*cs) -> (cutn*N, C, cs, cs), same order as torch.cat.
        # TODO(synk): emit bf16 from the kernel / fold this permutation into
        # out_specs to halve the post-kernel HBM traffic if downstream allows.
        out = out_raw.reshape(ngroups, cs, NC, G, cs)     # (g, i, nc, kl, j)
        out = jnp.transpose(out, (0, 3, 2, 1, 4))         # (g, kl, nc, i, j)
        out = out.reshape(cutn * N, C, cs, cs)
        return out, sizes, offy, offx


# ----------------------------------------------------------------------------- test

def _ref_adaptive_pool(crop, out_size):
    """NumPy reference for F.adaptive_avg_pool2d (PyTorch bin semantics)."""
    N, C, H, W = crop.shape
    out = np.zeros((N, C, out_size, out_size), dtype=np.float32)
    for i in range(out_size):
        ys, ye = (i * H) // out_size, -((-(i + 1) * H) // out_size)
        for j in range(out_size):
            xs, xe = (j * W) // out_size, -((-(j + 1) * W) // out_size)
            out[:, :, i, j] = crop[:, :, ys:ye, xs:xe].mean(axis=(2, 3))
    return out


if __name__ == "__main__":
    root = jax.random.PRNGKey(0)
    kx, kcall = jax.random.split(root, 2)

    N, C, H, W = 2, 4, 16, 16
    cut_size, cutn, cut_pow = 8, 4, 1.0

    x = jax.random.normal(kx, (N, C, H, W), dtype=jnp.float32)

    module = MakeCutouts(cut_size=cut_size, cutn=cutn, cut_pow=cut_pow)
    out, sizes, offy, offx = module(x, kcall)
    out = jax.block_until_ready(out)

    sizes_h = np.asarray(jax.device_get(sizes))
    offy_h = np.asarray(jax.device_get(offy))
    offx_h = np.asarray(jax.device_get(offx))

    # correctness check against direct crop + adaptive pool (exact f32 reference)
    x_np = np.asarray(x)
    refs = []
    for k in range(cutn):
        s, oy, ox = int(sizes_h[k]), int(offy_h[k]), int(offx_h[k])
        crop = x_np[:, :, oy:oy + s, ox:ox + s]
        refs.append(_ref_adaptive_pool(crop, cut_size))
    ref = np.concatenate(refs, axis=0)

    assert out.shape == (cutn * N, C, cut_size, cut_size), out.shape
    # bf16 MXU operands with f32 accumulation -> relaxed tolerance vs exact f32 ref.
    np.testing.assert_allclose(np.asarray(out), ref, rtol=3e-2, atol=3e-2)
    print("KERNEL_OK")
</pallas_src>

<mosaic_0001>
module attributes {stable_mosaic.version = 11 : i64} {
  func.func @_cutouts_group_kernel(%arg0: i32, %arg1: memref<16x1024xbf16, #tpu.memory_space<vmem>>, %arg2: memref<1x16x16xbf16, #tpu.memory_space<vmem>>, %arg3: memref<1x128x16xbf16, #tpu.memory_space<vmem>>, %arg4: memref<1x64x16xf32, #tpu.memory_space<vmem>>) attributes {dimension_semantics = [#tpu.dimension_semantics<parallel>], iteration_bounds = array<i64: 2>, scalar_prefetch = 0 : i64, scratch_operands = 0 : i64, tpu.core_type = #tpu.core_type<tc>, window_params = [{pipeline_mode = #tpu.pipeline_mode<synchronous>, transform_indices = @transform_0, window_bounds = array<i64: 16, 1024>}, {transform_indices = @transform_1, window_bounds = array<i64: 1, 16, 16>}, {transform_indices = @transform_2, window_bounds = array<i64: 1, 128, 16>}, {transform_indices = @transform_3, window_bounds = array<i64: 1, 64, 16>}]} {
    %c0 = arith.constant 0 : index
    %c0_0 = arith.constant 0 : index
    %0 = vector.load %arg1[%c0, %c0_0] : memref<16x1024xbf16, #tpu.memory_space<vmem>>, vector<16x1024xbf16>
    %c0_1 = arith.constant 0 : index
    %c0_2 = arith.constant 0 : index
    %c0_3 = arith.constant 0 : index
    %1 = vector.load %arg2[%c0_1, %c0_2, %c0_3] : memref<1x16x16xbf16, #tpu.memory_space<vmem>>, vector<1x16x16xbf16>
    %2 = vector.shape_cast %1 : vector<1x16x16xbf16> to vector<16x16xbf16>
    %cst = arith.constant dense<0.000000e+00> : vector<16x1024xf32>
    %3 = tpu.matmul %2, %0, %cst {dimension_numbers = #tpu.dot_dimension_numbers<[1], [0], [0], [1], [0, 0, 1, 1], [], []>} : vector<16x16xbf16>, vector<16x1024xbf16>, vector<16x1024xf32> -> vector<16x1024xf32>
    %4 = arith.truncf %3 : vector<16x1024xf32> to vector<16x1024xbf16>
    %5 = vector.extract_strided_slice %4 {offsets = [0, 0], sizes = [8, 1024], strides = [1, 1]} : vector<16x1024xbf16> to vector<8x1024xbf16>
    %6 = vector.shape_cast %5 : vector<8x1024xbf16> to vector<64x128xbf16>
    %c0_4 = arith.constant 0 : index
    %c0_5 = arith.constant 0 : index
    %c0_6 = arith.constant 0 : index
    %7 = vector.load %arg3[%c0_4, %c0_5, %c0_6] : memref<1x128x16xbf16, #tpu.memory_space<vmem>>, vector<1x128x8xbf16>
    %8 = vector.shape_cast %7 : vector<1x128x8xbf16> to vector<128x8xbf16>
    %cst_7 = arith.constant dense<0.000000e+00> : vector<64x8xf32>
    %9 = tpu.matmul %6, %8, %cst_7 {dimension_numbers = #tpu.dot_dimension_numbers<[1], [0], [0], [1], [0, 0, 1, 1], [], []>} : vector<64x128xbf16>, vector<128x8xbf16>, vector<64x8xf32> -> vector<64x8xf32>
    %c0_8 = arith.constant 0 : index
    %c0_9 = arith.constant 0 : index
    %c0_10 = arith.constant 0 : index
    %10 = vector.load %arg4[%c0_8, %c0_9, %c0_10] : memref<1x64x16xf32, #tpu.memory_space<vmem>>, vector<1x64x8xf32>
    %11 = vector.shape_cast %10 : vector<1x64x8xf32> to vector<64x8xf32>
    %12 = vector.shape_cast %9 : vector<64x8xf32> to vector<1x64x8xf32>
    tpu.vector_store %arg4[%c0_8, %c0_9, %c0_10], %12 {strides = array<i32>} : memref<1x64x16xf32, #tpu.memory_space<vmem>>, vector<1x64x8xf32>,
    %13 = vector.extract_strided_slice %4 {offsets = [8, 0], sizes = [8, 1024], strides = [1, 1]} : vector<16x1024xbf16> to vector<8x1024xbf16>
    %14 = vector.shape_cast %13 : vector<8x1024xbf16> to vector<64x128xbf16>
    %c0_11 = arith.constant 0 : index
    %c0_12 = arith.constant 0 : index
    %c8 = arith.constant 8 : index
    %15 = vector.load %arg3[%c0_11, %c0_12, %c8] : memref<1x128x16xbf16, #tpu.memory_space<vmem>>, vector<1x128x8xbf16>
    %16 = vector.shape_cast %15 : vector<1x128x8xbf16> to vector<128x8xbf16>
    %cst_13 = arith.constant dense<0.000000e+00> : vector<64x8xf32>
    %17 = tpu.matmul %14, %16, %cst_13 {dimension_numbers = #tpu.dot_dimension_numbers<[1], [0], [0], [1], [0, 0, 1, 1], [], []>} : vector<64x128xbf16>, vector<128x8xbf16>, vector<64x8xf32> -> vector<64x8xf32>
    %c0_14 = arith.constant 0 : index
    %c0_15 = arith.constant 0 : index
    %c8_16 = arith.constant 8 : index
    %18 = vector.load %arg4[%c0_14, %c0_15, %c8_16] : memref<1x64x16xf32, #tpu.memory_space<vmem>>, vector<1x64x8xf32>
    %19 = vector.shape_cast %18 : vector<1x64x8xf32> to vector<64x8xf32>
    %20 = vector.shape_cast %17 : vector<64x8xf32> to vector<1x64x8xf32>
    tpu.vector_store %arg4[%c0_14, %c0_15, %c8_16], %20 {strides = array<i32>} : memref<1x64x16xf32, #tpu.memory_space<vmem>>, vector<1x64x8xf32>,
    return
  }
  func.func @transform_0(%arg0: i32) -> (i32, i32) {
    %c0_i32 = arith.constant 0 : i32
    %c0_i32_0 = arith.constant 0 : i32
    %c0_i32_1 = arith.constant 0 : i32
    return %c0_i32, %c0_i32_0 : i32, i32
  }
  func.func @transform_1(%arg0: i32) -> (i32, i32, i32) {
    %c0_i32 = arith.constant 0 : i32
    %c0_i32_0 = arith.constant 0 : i32
    %c0_i32_1 = arith.constant 0 : i32
    return %arg0, %c0_i32, %c0_i32_0 : i32, i32, i32
  }
  func.func @transform_2(%arg0: i32) -> (i32, i32, i32) {
    %c0_i32 = arith.constant 0 : i32
    %c0_i32_0 = arith.constant 0 : i32
    %c0_i32_1 = arith.constant 0 : i32
    return %arg0, %c0_i32, %c0_i32_0 : i32, i32, i32
  }
  func.func @transform_3(%arg0: i32) -> (i32, i32, i32) {
    %c0_i32 = arith.constant 0 : i32
    %c0_i32_0 = arith.constant 0 : i32
    %c0_i32_1 = arith.constant 0 : i32
    return %arg0, %c0_i32, %c0_i32_0 : i32, i32, i32
  }
}

module attributes {stable_mosaic.version = 11 : i64} {
  func.func @_cutouts_group_kernel(%arg0: i32, %arg1: memref<16x1024xbf16, #tpu.memory_space<vmem>>, %arg2: memref<1x16x16xbf16, #tpu.memory_space<vmem>>, %arg3: memref<1x128x16xbf16, #tpu.memory_space<vmem>>, %arg4: memref<1x64x16xf32, #tpu.memory_space<vmem>>) attributes {dimension_semantics = [#tpu.dimension_semantics<parallel>], iteration_bounds = array<i64: 2>, scalar_prefetch = 0 : i64, scratch_operands = 0 : i64, tpu.core_type = #tpu.core_type<tc>, window_params = [{pipeline_mode = #tpu.pipeline_mode<synchronous>, transform_indices = @transform_0, window_bounds = array<i64: 16, 1024>}, {transform_indices = @transform_1, window_bounds = array<i64: 1, 16, 16>}, {transform_indices = @transform_2, window_bounds = array<i64: 1, 128, 16>}, {transform_indices = @transform_3, window_bounds = array<i64: 1, 64, 16>}]} {
    %c0 = arith.constant 0 : index
    %c0_0 = arith.constant 0 : index
    %0 = vector.load %arg1[%c0, %c0_0] : memref<16x1024xbf16, #tpu.memory_space<vmem>>, vector<16x1024xbf16>
    %c0_1 = arith.constant 0 : index
    %c0_2 = arith.constant 0 : index
    %c0_3 = arith.constant 0 : index
    %1 = vector.load %arg2[%c0_1, %c0_2, %c0_3] : memref<1x16x16xbf16, #tpu.memory_space<vmem>>, vector<1x16x16xbf16>
    %2 = vector.shape_cast %1 : vector<1x16x16xbf16> to vector<16x16xbf16>
    %cst = arith.constant dense<0.000000e+00> : vector<16x1024xf32>
    %3 = tpu.matmul %2, %0, %cst {dimension_numbers = #tpu.dot_dimension_numbers<[1], [0], [0], [1], [0, 0, 1, 1], [], []>} : vector<16x16xbf16>, vector<16x1024xbf16>, vector<16x1024xf32> -> vector<16x1024xf32>
    %4 = arith.truncf %3 : vector<16x1024xf32> to vector<16x1024xbf16>
    %5 = vector.extract_strided_slice %4 {offsets = [0, 0], sizes = [8, 1024], strides = [1, 1]} : vector<16x1024xbf16> to vector<8x1024xbf16>
    %6 = vector.shape_cast %5 : vector<8x1024xbf16> to vector<64x128xbf16>
    %c0_4 = arith.constant 0 : index
    %c0_5 = arith.constant 0 : index
    %c0_6 = arith.constant 0 : index
    %7 = vector.load %arg3[%c0_4, %c0_5, %c0_6] : memref<1x128x16xbf16, #tpu.memory_space<vmem>>, vector<1x128x8xbf16>
    %8 = vector.shape_cast %7 : vector<1x128x8xbf16> to vector<128x8xbf16>
    %cst_7 = arith.constant dense<0.000000e+00> : vector<64x8xf32>
    %9 = tpu.matmul %6, %8, %cst_7 {dimension_numbers = #tpu.dot_dimension_numbers<[1], [0], [0], [1], [0, 0, 1, 1], [], []>} : vector<64x128xbf16>, vector<128x8xbf16>, vector<64x8xf32> -> vector<64x8xf32>
    %c0_8 = arith.constant 0 : index
    %c0_9 = arith.constant 0 : index
    %c0_10 = arith.constant 0 : index
    %10 = vector.load %arg4[%c0_8, %c0_9, %c0_10] : memref<1x64x16xf32, #tpu.memory_space<vmem>>, vector<1x64x8xf32>
    %11 = vector.shape_cast %10 : vector<1x64x8xf32> to vector<64x8xf32>
    %12 = vector.shape_cast %9 : vector<64x8xf32> to vector<1x64x8xf32>
    tpu.vector_store %arg4[%c0_8, %c0_9, %c0_10], %12 {strides = array<i32>} : memref<1x64x16xf32, #tpu.memory_space<vmem>>, vector<1x64x8xf32>,
    %13 = vector.extract_strided_slice %4 {offsets = [8, 0], sizes = [8, 1024], strides = [1, 1]} : vector<16x1024xbf16> to vector<8x1024xbf16>
    %14 = vector.shape_cast %13 : vector<8x1024xbf16> to vector<64x128xbf16>
    %c0_11 = arith.constant 0 : index
    %c0_12 = arith.constant 0 : index
    %c8 = arith.constant 8 : index
    %15 = vector.load %arg3[%c0_11, %c0_12, %c8] : memref<1x128x16xbf16, #tpu.memory_space<vmem>>, vector<1x128x8xbf16>
    %16 = vector.shape_cast %15 : vector<1x128x8xbf16> to vector<128x8xbf16>
    %cst_13 = arith.constant dense<0.000000e+00> : vector<64x8xf32>
    %17 = tpu.matmul %14, %16, %cst_13 {dimension_numbers = #tpu.dot_dimension_numbers<[1], [0], [0], [1], [0, 0, 1, 1], [], []>} : vector<64x128xbf16>, vector<128x8xbf16>, vector<64x8xf32> -> vector<64x8xf32>
    %c0_14 = arith.constant 0 : index
    %c0_15 = arith.constant 0 : index
    %c8_16 = arith.constant 8 : index
    %18 = vector.load %arg4[%c0_14, %c0_15, %c8_16] : memref<1x64x16xf32, #tpu.memory_space<vmem>>, vector<1x64x8xf32>
    %19 = vector.shape_cast %18 : vector<1x64x8xf32> to vector<64x8xf32>
    %20 = vector.shape_cast %17 : vector<64x8xf32> to vector<1x64x8xf32>
    tpu.vector_store %arg4[%c0_14, %c0_15, %c8_16], %20 {strides = array<i32>} : memref<1x64x16xf32, #tpu.memory_space<vmem>>, vector<1x64x8xf32>,
    return
  }
  func.func @transform_0(%arg0: i32) -> (i32, i32) {
    %c0_i32 = arith.constant 0 : i32
    %c0_i32_0 = arith.constant 0 : i32
    %c0_i32_1 = arith.constant 0 : i32
    return %c0_i32, %c0_i32_0 : i32, i32
  }
  func.func @transform_1(%arg0: i32) -> (i32, i32, i32) {
    %c0_i32 = arith.constant 0 : i32
    %c0_i32_0 = arith.constant 0 : i32
    %c0_i32_1 = arith.constant 0 : i32
    return %arg0, %c0_i32, %c0_i32_0 : i32, i32, i32
  }
  func.func @transform_2(%arg0: i32) -> (i32, i32, i32) {
    %c0_i32 = arith.constant 0 : i32
    %c0_i32_0 = arith.constant 0 : i32
    %c0_i32_1 = arith.constant 0 : i32
    return %arg0, %c0_i32, %c0_i32_0 : i32, i32, i32
  }
  func.func @transform_3(%arg0: i32) -> (i32, i32, i32) {
    %c0_i32 = arith.constant 0 : i32
    %c0_i32_0 = arith.constant 0 : i32
    %c0_i32_1 = arith.constant 0 : i32
    return %arg0, %c0_i32, %c0_i32_0 : i32, i32, i32
  }
}

</mosaic_0001>

<bundles_post_ra>
// kernel: tpu_custom_call.1
= control target key start
LH: loop header
LB: loop body
LE: loop exit
PB: predicated region body
PF: predicated region fallthrough
CT: control target
= control target key end

     0   :  { %s1232_s12 = smov 0   ;;  %s1346_s0 = inlined_call_operand.vmem [shape: bf16[16,1024], index: 0, kind: input, shape index: {}]   ;;  %s1347_s1 = inlined_call_operand.vmem [shape: bf16[2,16,16], index: 1, kind: input, shape index: {}]   ;;  %s1348_s2 = inlined_call_operand.vmem [shape: bf16[2,128,16], index: 2, kind: input, shape index: {}]   ;;  %s1349_s3 = inlined_call_operand.vmem [shape: f32[2,64,16], index: 3, kind: output, shape index: {}]  }
   0x1 LB: > { %s1046_s13 = sadd.s32 4294967295, %s1206_s12   ;;  %p1050_p0 = scmp.ge.s32.totalorder %s1206_s12, 1  ;;  %s1206_s12 = sphi %s1232_s12, %s13_s12  }
   0x2   : > { %p147_p1 = scmp.lt.s32.totalorder %s1206_s12, 3 }
   0x4   : > { %p148_p2 = pnand %p1050_p0, %p147_p1 }
   0x5   : > { %v192_v0 = vld [vmem:[%s1346_s0] sm:$0xff] (!%p148_p2)  ;;  %v193_v2 = vld [vmem:[%s1346_s0 + $0x8] sm:$0xff] (!%p148_p2)  ;;  %p1249_p3 = scmp.lt.s32.totalorder (!%p148_p2), %s1046_s13, 1  ;;  %v1208_v6 = vmov (!%p148_p2), 0   ;;  %v194_v7 = vld [vmem:[%s1346_s0 + $0x10] sm:$0xff] (!%p148_p2)  ;;  %vm247_vm0 = vcmask (!%p148_p2), 130048   ;;  %v446_v44 = vlaneseq (!%p148_p2) }
   0x6   : > { %151 = sbr.rel (%p148_p2) target bundleno = 610 (0x262), region = 32  ;;  %v196_v1 = vld [vmem:[%s1346_s0 + $0x20] sm:$0xff] (!%p148_p2)  ;;  %v197_v4 = vld [vmem:[%s1346_s0 + $0x28] sm:$0xff] (!%p148_p2)  ;;  %283 = vmatprep.mubr.bf16.mxu0 (!%p148_p2), %v1208_v6  ;;  %326 = vmatprep.mubr.bf16.mxu1 (!%p148_p2), %v1208_v6  ;;  %v198_v8 = vld [vmem:[%s1346_s0 + $0x30] sm:$0xff] (!%p148_p2)  ;;  %s1209_s14 = smov (!%p148_p2), 120   ;;  %vm676_vm1 = vcmask (!%p148_p2), 64512  }
   0x7   : > { %v1059_v3 = vcombine.high (!%p148_p2), %v192_v0, %v196_v1  ;;  %v1058_v5 = vcombine.low (!%p148_p2), %v192_v0, %v196_v1  ;;  %v1061_v9 = vcombine.high (!%p148_p2), %v193_v2, %v197_v4  ;;  %v1060_v10 = vcombine.low (!%p148_p2), %v193_v2, %v197_v4  ;;  %v195_v12 = vld [vmem:[%s1346_s0 + $0x18] sm:$0xff] (!%p148_p2) }
   0x8   : > { %v1063_v11 = vcombine.high (!%p148_p2), %v194_v7, %v198_v8  ;;  %v199_v13 = vld [vmem:[%s1346_s0 + $0x38] sm:$0xff] (!%p148_p2)  ;;  %v1062_v15 = vcombine.low (!%p148_p2), %v194_v7, %v198_v8  ;;  %v1210_v42 = vmov (!%p148_p2), 1966171168   ;;  %v447_v46 = vshrl.u32 (!%p148_p2), %v446_v44, 7 }
   0x9   : > { %251 = vmatprep.subr.bf16.mxu0 (!%p148_p2), %v1059_v3  ;;  %v1065_v14 = vcombine.high (!%p148_p2), %v195_v12, %v199_v13  ;;  %294 = vmatprep.subr.bf16.mxu1 (!%p148_p2), %v1061_v9  ;;  %v1064_v16 = vcombine.low (!%p148_p2), %v195_v12, %v199_v13  ;;  %v444_v43 = vunpack.c.l.s4 (!%p148_p2), %v1210_v42  ;;  %vm970_vm2 = vcmask (!%p148_p2), 130112  }
   0xa   : > { %252 = vmatpush1.bf16.msra.mxu0 (!%p148_p2), %v1058_v5  ;;  %295 = vmatpush1.bf16.msra.mxu1 (!%p148_p2), %v1060_v10 }
   0xb   : > { %337 = vmatprep.subr.bf16.mxu0 (!%p148_p2), %v1063_v11  ;;  %380 = vmatprep.subr.bf16.mxu1 (!%p148_p2), %v1065_v14  ;;  %v445_v45 = vunpack.c.0.s8 (!%p148_p2), %v444_v43 }
   0xd   : > { %s1352_s13 = smov (!%p1249_p3, %s1046_s13), 1  ;;  %v448_v49 = vsub.s32 %v445_v45, %v447_v46 }
   0xe   : > { %s1096_s4 = sshll.u32 %s1352_s13, 3  ;;  %s1097_s5 = sshll.u32 %s1352_s13, 6 }
   0xf   : > { %s180_s8 = scalar_lea.vmem %s1347_s1, %s1096_s4  ;;  %s1282_s11 = scalar_lea.vmem %s1348_s2, %s1097_s5 }
  0x10   : > { %v1183_v17 = vld [vmem:[%s180_s8] sm:$0xff]   ;;  %v1185_v19 = vld [vmem:[%s1282_s11 + $0x8] sm:$0xff]   ;;  %v1186_v20 = vld [vmem:[%s1282_s11 + $0x10] sm:$0xff]   ;;  %s1309_s17 = scalar_lea.vmem %s1349_s3, %s1097_s5  ;;  %s1211_s13 = smov 8  }
  0x11   : > { %v1184_v18 = vld [vmem:[%s1282_s11] sm:$0xff]   ;;  %1066 = vmatmul.mubr.msk.bf16.vlgmr.msra.gmra.mrb[0].mxu0 %vm247_vm0, %v1183_v17  ;;  %1067 = vmatmul.mubr.msk.bf16.vlgmr.msra.gmra.mrb[0].mxu1 %vm247_vm0, %v1183_v17  ;;  %v1187_v21 = vld [vmem:[%s1282_s11 + $0x18] sm:$0xff]   ;;  %v1189_v23 = vld [vmem:[%s1282_s11 + $0x28] sm:$0xff]  }
  0x12   : > { %338 = vmatpush1.bf16.msra.mxu0 %v1062_v15  ;;  %381 = vmatpush1.bf16.msra.mxu1 %v1064_v16  ;;  %v1188_v22 = vld [vmem:[%s1282_s11 + $0x20] sm:$0xff]   ;;  %v1190_v24 = vld [vmem:[%s1282_s11 + $0x30] sm:$0xff]   ;;  %v1191_v25 = vld [vmem:[%s1282_s11 + $0x38] sm:$0xff]  }
  0x13   : > { %369 = vmatprep.mubr.bf16.mxu0 %v1208_v6  ;;  %412 = vmatprep.mubr.bf16.mxu1 %v1208_v6  ;;  %v1192_v26 = vld [vmem:[%s1282_s11] sm:$0xff]   ;;  %v1193_v27 = vld [vmem:[%s1282_s11 + $0x8] sm:$0xff]   ;;  %v1194_v28 = vld [vmem:[%s1282_s11 + $0x10] sm:$0xff]  }
  0x14   : > { %849 = vrot.lane.b32.xlu0 %v1184_v18, %s1209_s14  ;;  %853 = vrot.lane.b32.xlu1 %v1186_v20, %s1209_s14  ;;  %v1195_v29 = vld [vmem:[%s1282_s11 + $0x18] sm:$0xff]   ;;  %v1196_v30 = vld [vmem:[%s1282_s11 + $0x20] sm:$0xff]  }
  0x15   : > { %1123 = vmatprep.subr.bf16.mxu0 %v1192_v26  ;;  %v1197_v31 = vld [vmem:[%s1282_s11 + $0x28] sm:$0xff]   ;;  %v1198_v32 = vld [vmem:[%s1282_s11 + $0x30] sm:$0xff]   ;;  %v1199_v33 = vld [vmem:[%s1282_s11 + $0x38] sm:$0xff]  }
  0x18   : > { %851 = vrot.lane.b32.xlu0 %v1185_v19, %s1209_s14  ;;  %855 = vrot.lane.b32.xlu1 %v1187_v21, %s1209_s14 }
  0x19   : > { %1068 = vmatmul.mubr.msk.bf16.vlgmr.msra.gmra.mrb[4].mxu0 %vm247_vm0, %v1183_v17  ;;  %1069 = vmatmul.mubr.msk.bf16.vlgmr.msra.gmra.mrb[4].mxu1 %vm247_vm0, %v1183_v17 }
  0x1a   : > { %1124 = vmatpush3.bf16.msra.mxu0 %v1192_v26 }
  0x1b   : > { %1125 = vmatprep.subr.bf16.mxu0 %v1193_v27 }
  0x1c   : > { %857 = vrot.lane.b32.xlu0 %v1188_v22, %s1209_s14  ;;  %859 = vrot.lane.b32.xlu1 %v1189_v23, %s1209_s14 }
  0x1e   : > { %1126 = vmatpush3.bf16.msra.mxu0 %v1193_v27 }
  0x1f   : > { %1127 = vmatprep.subr.bf16.mxu0 %v1194_v28 }
  0x20   : > { %861 = vrot.lane.b32.xlu0 %v1190_v24, %s1209_s14  ;;  %863 = vrot.lane.b32.xlu1 %v1191_v25, %s1209_s14 }
  0x22   : > { %1128 = vmatpush3.bf16.msra.mxu0 %v1194_v28 }
  0x23   : > { %1129 = vmatprep.subr.bf16.mxu0 %v1195_v29 }
  0x26   : > { %1130 = vmatpush3.bf16.msra.mxu0 %v1195_v29 }
  0x27   : > { %1131 = vmatprep.subr.bf16.mxu0 %v1196_v30 }
  0x2a   : > { %1132 = vmatpush3.bf16.msra.mxu0 %v1196_v30 }
  0x2b   : > { %1133 = vmatprep.subr.bf16.mxu0 %v1197_v31 }
  0x2e   : > { %1134 = vmatpush3.bf16.msra.mxu0 %v1197_v31 }
  0x2f   : > { %1135 = vmatprep.subr.bf16.mxu0 %v1198_v32 }
  0x32   : > { %1136 = vmatpush3.bf16.msra.mxu0 %v1198_v32 }
  0x33   : > { %1137 = vmatprep.subr.bf16.mxu0 %v1199_v33 }
  0x36   : > { %1138 = vmatpush3.bf16.msra.mxu0 %v1199_v33 }
  0x86   : > { %v850_v34 = vpop.permute.xlu0 %849  ;;  %v854_v35 = vpop.permute.xlu1 %853 }
  0x87   : > { %1147 = vmatprep.subr.bf16.mxu1 %v850_v34 }
  0x88   : > { %1148 = vmatpush3.bf16.msra.mxu1 %v850_v34 }
  0x8a   : > { %v852_v36 = vpop.permute.xlu0 %851  ;;  %v856_v37 = vpop.permute.xlu1 %855 }
  0x8b   : > { %1149 = vmatprep.subr.bf16.mxu1 %v852_v36 }
  0x8c   : > { %1150 = vmatpush3.bf16.msra.mxu1 %v852_v36 }
  0x8d   : > { %1151 = vmatprep.subr.bf16.mxu1 %v854_v35 }
  0x8e   : > { %v858_v38 = vpop.permute.xlu0 %857  ;;  %v860_v39 = vpop.permute.xlu1 %859 }
  0x90   : > { %1152 = vmatpush3.bf16.msra.mxu1 %v854_v35 }
  0x91   : > { %1153 = vmatprep.subr.bf16.mxu1 %v856_v37 }
  0x92   : > { %v862_v40 = vpop.permute.xlu0 %861  ;;  %v864_v41 = vpop.permute.xlu1 %863 }
  0x94   : > { %1154 = vmatpush3.bf16.msra.mxu1 %v856_v37 }
  0x95   : > { %1155 = vmatprep.subr.bf16.mxu1 %v858_v38 }
  0x98   : > { %1156 = vmatpush3.bf16.msra.mxu1 %v858_v38 }
  0x99   : > { %1157 = vmatprep.subr.bf16.mxu1 %v860_v39 }
  0x9c   : > { %1158 = vmatpush3.bf16.msra.mxu1 %v860_v39 }
  0x9d   : > { %1159 = vmatprep.subr.bf16.mxu1 %v862_v40 }
  0xa0   : > { %1160 = vmatpush3.bf16.msra.mxu1 %v862_v40 }
  0xa1   : > { %1161 = vmatprep.subr.bf16.mxu1 %v864_v41 }
  0xa4   : > { %1162 = vmatpush3.bf16.msra.mxu1 %v864_v41 }
  0xe4   : > { %v285_v47 = vpop.f32.mrb[0].mxu0  ;;  %v328_v48 = vpop.f32.mrb[0].mxu1 }
  0xe5   : > { %v287_v50 = vpop.f32.mrb[1].mxu0  ;;  %v330_v51 = vpop.f32.mrb[1].mxu1 }
  0xe6   : > { %v1070_v52 = vpack.c.bf16 %v287_v50, %v285_v47  ;;  %v1071_v53 = vpack.c.bf16 %v330_v51, %v328_v48  ;;  %v289_v54 = vpop.f32.mrb[2].mxu0  ;;  %v332_v55 = vpop.f32.mrb[2].mxu1 }
  0xe7   : > { %v291_v56 = vpop.f32.mrb[3].mxu0  ;;  %v334_v57 = vpop.f32.mrb[3].mxu1 }
  0xe8   : > { %v449_v58 = vrot.slane %v1070_v52, %v448_v49  ;;  %v456_v59 = vrot.slane %v1071_v53, %v448_v49  ;;  %v1082_v60 = vpack.c.bf16 %v291_v56, %v289_v54  ;;  %v1083_v61 = vpack.c.bf16 %v334_v57, %v332_v55 }
  0xea   : > { %v471_v62 = vcombine.low %v449_v58, %v456_v59  ;;  %v472_v63 = vcombine.high %v449_v58, %v456_v59  ;;  %v695_v0 = vrot.slane %v1082_v60, %v448_v49  ;;  %v702_v1 = vrot.slane %v1083_v61, %v448_v49 }
  0xec   : > { %v717_v2 = vcombine.low %v695_v0, %v702_v1  ;;  %v718_v3 = vcombine.high %v695_v0, %v702_v1  ;;  %v371_v4 = vpop.f32.mrb[4].mxu0  ;;  %v414_v5 = vpop.f32.mrb[4].mxu1  ;;  %v481_v22 = vrot.slane %v471_v62, %v448_v49  ;;  %v488_v23 = vrot.slane %v472_v63, %v448_v49 }
  0xed   : > { %v373_v6 = vpop.f32.mrb[5].mxu0  ;;  %v416_v7 = vpop.f32.mrb[5].mxu1 }
  0xee   : > { %v1072_v8 = vpack.c.bf16 %v373_v6, %v371_v4  ;;  %v1073_v9 = vpack.c.bf16 %v416_v7, %v414_v5  ;;  %v375_v10 = vpop.f32.mrb[6].mxu0  ;;  %v418_v11 = vpop.f32.mrb[6].mxu1  ;;  %v727_v32 = vrot.slane %v717_v2, %v448_v49  ;;  %v734_v33 = vrot.slane %v718_v3, %v448_v49 }
  0xef   : > { %v377_v12 = vpop.f32.mrb[7].mxu0  ;;  %v420_v13 = vpop.f32.mrb[7].mxu1 }
  0xf0   : > { %v463_v14 = vrot.slane %v1072_v8, %v448_v49  ;;  %v470_v15 = vrot.slane %v1073_v9, %v448_v49  ;;  %v1084_v16 = vpack.c.bf16 %v377_v12, %v375_v10  ;;  %v1085_v17 = vpack.c.bf16 %v420_v13, %v418_v11 }
  0xf2   : > { %v473_v18 = vcombine.low %v463_v14, %v470_v15  ;;  %v474_v19 = vcombine.high %v463_v14, %v470_v15  ;;  %v709_v20 = vrot.slane %v1084_v16, %v448_v49  ;;  %v716_v21 = vrot.slane %v1085_v17, %v448_v49 }
  0xf4   : > { %v495_v24 = vrot.slane %v473_v18, %v448_v49  ;;  %v502_v25 = vrot.slane %v474_v19, %v448_v49  ;;  %v719_v26 = vcombine.low %v709_v20, %v716_v21  ;;  %v720_v27 = vcombine.high %v709_v20, %v716_v21 }
  0xf6   : > { %v503_v28 = vcombine.low %v481_v22, %v495_v24  ;;  %v504_v29 = vcombine.high %v481_v22, %v495_v24  ;;  %v505_v30 = vcombine.low %v488_v23, %v502_v25  ;;  %v506_v31 = vcombine.high %v488_v23, %v502_v25 }
  0xf7   : > { %v741_v34 = vrot.slane %v719_v26, %v448_v49  ;;  %v748_v35 = vrot.slane %v720_v27, %v448_v49 }
  0xf8   : > { %v507_v36 = vunpack.c.l.b16 %v503_v28  ;;  %v508_v37 = vunpack.c.h.b16 %v503_v28  ;;  %v517_v38 = vunpack.c.l.b16 %v505_v30  ;;  %v518_v39 = vunpack.c.h.b16 %v505_v30 }
  0xf9   : > { %v527_v40 = vunpack.c.l.b16 %v504_v29  ;;  %v528_v41 = vunpack.c.h.b16 %v504_v29  ;;  %v537_v42 = vunpack.c.l.b16 %v506_v31  ;;  %v538_v43 = vunpack.c.h.b16 %v506_v31 }
  0xfa   : > { %v519_v44 = vpack.i.b16 %v518_v39, %v517_v38  ;;  %v749_v45 = vcombine.low %v727_v32, %v741_v34  ;;  %v750_v46 = vcombine.high %v727_v32, %v741_v34  ;;  %v751_v47 = vcombine.low %v734_v33, %v748_v35 }
  0xfb   : > { %v752_v48 = vcombine.high %v734_v33, %v748_v35  ;;  %v509_v50 = vpack.i.b16 %v508_v37, %v507_v36  ;;  %v529_v51 = vpack.i.b16 %v528_v41, %v527_v40  ;;  %v539_v52 = vpack.i.b16 %v538_v43, %v537_v42 }
  0xfc   : > { %v753_v53 = vunpack.c.l.b16 %v749_v45  ;;  %v754_v54 = vunpack.c.h.b16 %v749_v45  ;;  %v763_v55 = vunpack.c.l.b16 %v751_v47  ;;  %v764_v49 = vunpack.c.h.b16 %v751_v47 }
  0xfd   : > { %v773_v56 = vunpack.c.l.b16 %v750_v46  ;;  %v774_v57 = vunpack.c.h.b16 %v750_v46  ;;  %v783_v58 = vunpack.c.l.b16 %v752_v48  ;;  %v784_v59 = vunpack.c.h.b16 %v752_v48 }
  0xfe   : > { %v765_v60 = vpack.i.b16 %v764_v49, %v763_v55  ;;  %v510_v61 = vunpack.c.l.b16 %v509_v50  ;;  %v511_v62 = vunpack.c.h.b16 %v509_v50  ;;  %v520_v63 = vunpack.c.l.b16 %v519_v44 }
  0xff   : > { %v521_v0 = vunpack.c.h.b16 %v519_v44  ;;  %v530_v1 = vunpack.c.l.b16 %v529_v51  ;;  %v531_v2 = vunpack.c.h.b16 %v529_v51  ;;  %v755_v3 = vpack.i.b16 %v754_v54, %v753_v53 }
 0x100   : > { %v512_v4 = vpack.i.b16 %v511_v62, %v510_v61  ;;  %v766_v5 = vunpack.c.l.b16 %v765_v60  ;;  %v767_v6 = vunpack.c.h.b16 %v765_v60  ;;  %v775_v7 = vpack.i.b16 %v774_v57, %v773_v56 }
 0x101   : > { %v522_v8 = vpack.i.b16 %v521_v0, %v520_v63  ;;  %v532_v9 = vpack.i.b16 %v531_v2, %v530_v1  ;;  %v756_v10 = vunpack.c.l.b16 %v755_v3  ;;  %v757_v11 = vunpack.c.h.b16 %v755_v3 }
 0x102   : > { %v513_v12 = vunpack.c.l.b16 %v512_v4  ;;  %v514_v13 = vunpack.c.h.b16 %v512_v4  ;;  %v768_v14 = vpack.i.b16 %v767_v6, %v766_v5  ;;  %v776_v15 = vunpack.c.l.b16 %v775_v7 }
 0x103   : > { %v523_v16 = vunpack.c.l.b16 %v522_v8  ;;  %v524_v17 = vunpack.c.h.b16 %v522_v8  ;;  %v533_v18 = vunpack.c.l.b16 %v532_v9  ;;  %v534_v19 = vunpack.c.h.b16 %v532_v9 }
 0x104   : > { %v515_v20 = vpack.i.b16 %v514_v13, %v513_v12  ;;  %v758_v21 = vpack.i.b16 %v757_v11, %v756_v10  ;;  %v769_v22 = vunpack.c.l.b16 %v768_v14  ;;  %v770_v23 = vunpack.c.h.b16 %v768_v14 }
 0x105   : > { %v525_v24 = vpack.i.b16 %v524_v17, %v523_v16  ;;  %v777_v25 = vunpack.c.h.b16 %v775_v7  ;;  %v540_v26 = vunpack.c.l.b16 %v539_v52  ;;  %v535_v27 = vpack.i.b16 %v534_v19, %v533_v18 }
 0x106   : > { %1139 = vmatprep.mubr.bf16.mxu0 %v515_v20  ;;  %v759_v28 = vunpack.c.l.b16 %v758_v21  ;;  %v760_v29 = vunpack.c.h.b16 %v758_v21  ;;  %v541_v30 = vunpack.c.h.b16 %v539_v52  ;;  %v771_v31 = vpack.i.b16 %v770_v23, %v769_v22 }
 0x107   : > { %1140 = vmatmul.mubr.bf16.vlgmr.msra.gmra.mrb[8].mxu0 %v525_v24  ;;  %v778_v32 = vpack.i.b16 %v777_v25, %v776_v15  ;;  %v785_v33 = vpack.i.b16 %v784_v59, %v783_v58 }
 0x108   : > { %1143 = vmatprep.mubr.bf16.mxu0 %v535_v27  ;;  %v761_v34 = vpack.i.b16 %v760_v29, %v759_v28  ;;  %v542_v35 = vpack.i.b16 %v541_v30, %v540_v26 }
 0x109   : > { %v779_v36 = vunpack.c.l.b16 %v778_v32  ;;  %v780_v37 = vunpack.c.h.b16 %v778_v32  ;;  %v786_v38 = vunpack.c.l.b16 %v785_v33  ;;  %v787_v39 = vunpack.c.h.b16 %v785_v33 }
 0x10a   : > { %1163 = vmatprep.mubr.bf16.mxu1 %v761_v34  ;;  %v543_v40 = vunpack.c.l.b16 %v542_v35  ;;  %v544_v41 = vunpack.c.h.b16 %v542_v35 }
 0x10b   : > { %1164 = vmatmul.mubr.bf16.vlgmr.msra.gmra.mrb[8].mxu1 %v771_v31  ;;  %v781_v42 = vpack.i.b16 %v780_v37, %v779_v36  ;;  %v788_v43 = vpack.i.b16 %v787_v39, %v786_v38 }
 0x10c   : > { %v545_v44 = vpack.i.b16 %v544_v41, %v543_v40 }
 0x10d   : > { %1167 = vmatprep.mubr.bf16.mxu1 %v781_v42  ;;  %v789_v45 = vunpack.c.l.b16 %v788_v43  ;;  %v790_v46 = vunpack.c.h.b16 %v788_v43 }
 0x10f   : > { %1144 = vmatmul.mubr.bf16.gmra.mrb[12].mxu0 %v545_v44  ;;  %v791_v47 = vpack.i.b16 %v790_v46, %v789_v45 }
 0x113   : > { %1168 = vmatmul.mubr.bf16.gmra.mrb[12].mxu1 %v791_v47 }
 0x1da   : > { %v1141_v48 = vpop.f32.mrb[8].mxu0 }
 0x1db   : > { %679 = vst.msk [vmem:[%s1309_s17 + $0x10] sm:$0xff] %vm676_vm1, %v1141_v48  ;;  %v645_v50 = vpop.f32.mrb[9].mxu0 }
 0x1dc   : > { %677 = vst.msk [vmem:[%s1309_s17] sm:$0xff] %vm676_vm1, %v645_v50  ;;  %v1142_v51 = vpop.f32.mrb[10].mxu0 }
 0x1dd   : > { %680 = vst.msk [vmem:[%s1309_s17 + $0x18] sm:$0xff] %vm676_vm1, %v1142_v51  ;;  %v648_v52 = vpop.f32.mrb[11].mxu0 }
 0x1de   : > { %v1165_v53 = vpop.f32.mrb[8].mxu1  ;;  %678 = vst.msk [vmem:[%s1309_s17 + $0x8] sm:$0xff] %vm676_vm1, %v648_v52 }
 0x1df   : > { %950 = vrot.lane.b32.xlu0 %v1165_v53, %s1211_s13  ;;  %v907_v54 = vpop.f32.mrb[9].mxu1 }
 0x1e0   : > { %v1166_v55 = vpop.f32.mrb[10].mxu1 }
 0x1e1   : > { %952 = vrot.lane.b32.xlu1 %v1166_v55, %s1211_s13  ;;  %v910_v49 = vpop.f32.mrb[11].mxu1 }
 0x1e2   : > { %v1145_v56 = vpop.f32.mrb[12].mxu0 }
 0x1e3   : > { %946 = vrot.lane.b32.xlu0 %v907_v54, %s1211_s13  ;;  %683 = vst.msk [vmem:[%s1309_s17 + $0x30] sm:$0xff] %vm676_vm1, %v1145_v56  ;;  %v661_v57 = vpop.f32.mrb[13].mxu0 }
 0x1e4   : > { %681 = vst.msk [vmem:[%s1309_s17 + $0x20] sm:$0xff] %vm676_vm1, %v661_v57  ;;  %v1146_v58 = vpop.f32.mrb[14].mxu0 }
 0x1e5   : > { %948 = vrot.lane.b32.xlu1 %v910_v49, %s1211_s13  ;;  %684 = vst.msk [vmem:[%s1309_s17 + $0x38] sm:$0xff] %vm676_vm1, %v1146_v58  ;;  %v664_v59 = vpop.f32.mrb[15].mxu0 }
 0x1e6   : > { %v1169_v60 = vpop.f32.mrb[12].mxu1  ;;  %682 = vst.msk [vmem:[%s1309_s17 + $0x28] sm:$0xff] %vm676_vm1, %v664_v59 }
 0x1e7   : > { %v923_v61 = vpop.f32.mrb[13].mxu1 }
 0x1e8   : > { %954 = vrot.lane.b32.xlu0 %v923_v61, %s1211_s13  ;;  %v1170_v62 = vpop.f32.mrb[14].mxu1 }
 0x1e9   : > { %v926_v63 = vpop.f32.mrb[15].mxu1 }
 0x1ea   : > { %956 = vrot.lane.b32.xlu1 %v926_v63, %s1211_s13 }
 0x1ec   : > { %958 = vrot.lane.b32.xlu0 %v1169_v60, %s1211_s13 }
 0x1ee   : > { %960 = vrot.lane.b32.xlu1 %v1170_v62, %s1211_s13 }
 0x251   : > { %v951_v0 = vpop.permute.xlu0 %950 }
 0x252   : > { %973 = vst.msk [vmem:[%s1309_s17 + $0x10] sm:$0xff] %vm970_vm2, %v951_v0 }
 0x253   : > { %v953_v1 = vpop.permute.xlu1 %952 }
 0x254   : > { %974 = vst.msk [vmem:[%s1309_s17 + $0x18] sm:$0xff] %vm970_vm2, %v953_v1 }
 0x255   : > { %v947_v2 = vpop.permute.xlu0 %946 }
 0x256   : > { %971 = vst.msk [vmem:[%s1309_s17] sm:$0xff] %vm970_vm2, %v947_v2 }
 0x257   : > { %v949_v3 = vpop.permute.xlu1 %948 }
 0x258   : > { %972 = vst.msk [vmem:[%s1309_s17 + $0x8] sm:$0xff] %vm970_vm2, %v949_v3 }
 0x25a   : > { %v955_v4 = vpop.permute.xlu0 %954 }
 0x25b   : > { %975 = vst.msk [vmem:[%s1309_s17 + $0x20] sm:$0xff] %vm970_vm2, %v955_v4 }
 0x25c   : > { %v957_v5 = vpop.permute.xlu1 %956 }
 0x25d   : > { %976 = vst.msk [vmem:[%s1309_s17 + $0x28] sm:$0xff] %vm970_vm2, %v957_v5 }
 0x25e   : > { %v959_v6 = vpop.permute.xlu0 %958 }
 0x25f   : > { %977 = vst.msk [vmem:[%s1309_s17 + $0x30] sm:$0xff] %vm970_vm2, %v959_v6 }
 0x260   : > { %v961_v7 = vpop.permute.xlu1 %960 }
 0x261   : > { %978 = vst.msk [vmem:[%s1309_s17 + $0x38] sm:$0xff] %vm970_vm2, %v961_v7 }
 0x262 PF: > { %s13_s12 = sadd.s32 1, %s1206_s12  }
 0x263   : > { %p10_p4 = scmp.ge.s32.totalorder %s13_s12, 4  }
 0x265   :  { %12 = sbr.rel (!%p10_p4) target bundleno = 1 (0x1), region = 65 }

// kernel: tpu_custom_call.1
= control target key start
LH: loop header
LB: loop body
LE: loop exit
PB: predicated region body
PF: predicated region fallthrough
CT: control target
= control target key end

     0   :  { %s1232_s12 = smov 0   ;;  %s1346_s0 = inlined_call_operand.vmem [shape: bf16[16,1024], index: 0, kind: input, shape index: {}]   ;;  %s1347_s1 = inlined_call_operand.vmem [shape: bf16[2,16,16], index: 1, kind: input, shape index: {}]   ;;  %s1348_s2 = inlined_call_operand.vmem [shape: bf16[2,128,16], index: 2, kind: input, shape index: {}]   ;;  %s1349_s3 = inlined_call_operand.vmem [shape: f32[2,64,16], index: 3, kind: output, shape index: {}]  }
   0x1 LB: > { %s1046_s13 = sadd.s32 4294967295, %s1206_s12   ;;  %p1050_p0 = scmp.ge.s32.totalorder %s1206_s12, 1  ;;  %s1206_s12 = sphi %s1232_s12, %s13_s12  }
   0x2   : > { %p147_p1 = scmp.lt.s32.totalorder %s1206_s12, 3 }
   0x4   : > { %p148_p2 = pnand %p1050_p0, %p147_p1 }
   0x5   : > { %v192_v0 = vld [vmem:[%s1346_s0] sm:$0xff] (!%p148_p2)  ;;  %v193_v2 = vld [vmem:[%s1346_s0 + $0x8] sm:$0xff] (!%p148_p2)  ;;  %p1249_p3 = scmp.lt.s32.totalorder (!%p148_p2), %s1046_s13, 1  ;;  %v1208_v6 = vmov (!%p148_p2), 0   ;;  %v194_v7 = vld [vmem:[%s1346_s0 + $0x10] sm:$0xff] (!%p148_p2)  ;;  %vm247_vm0 = vcmask (!%p148_p2), 130048   ;;  %v446_v44 = vlaneseq (!%p148_p2) }
   0x6   : > { %151 = sbr.rel (%p148_p2) target bundleno = 610 (0x262), region = 32  ;;  %v196_v1 = vld [vmem:[%s1346_s0 + $0x20] sm:$0xff] (!%p148_p2)  ;;  %v197_v4 = vld [vmem:[%s1346_s0 + $0x28] sm:$0xff] (!%p148_p2)  ;;  %283 = vmatprep.mubr.bf16.mxu0 (!%p148_p2), %v1208_v6  ;;  %326 = vmatprep.mubr.bf16.mxu1 (!%p148_p2), %v1208_v6  ;;  %v198_v8 = vld [vmem:[%s1346_s0 + $0x30] sm:$0xff] (!%p148_p2)  ;;  %s1209_s14 = smov (!%p148_p2), 120   ;;  %vm676_vm1 = vcmask (!%p148_p2), 64512  }
   0x7   : > { %v1059_v3 = vcombine.high (!%p148_p2), %v192_v0, %v196_v1  ;;  %v1058_v5 = vcombine.low (!%p148_p2), %v192_v0, %v196_v1  ;;  %v1061_v9 = vcombine.high (!%p148_p2), %v193_v2, %v197_v4  ;;  %v1060_v10 = vcombine.low (!%p148_p2), %v193_v2, %v197_v4  ;;  %v195_v12 = vld [vmem:[%s1346_s0 + $0x18] sm:$0xff] (!%p148_p2) }
   0x8   : > { %v1063_v11 = vcombine.high (!%p148_p2), %v194_v7, %v198_v8  ;;  %v199_v13 = vld [vmem:[%s1346_s0 + $0x38] sm:$0xff] (!%p148_p2)  ;;  %v1062_v15 = vcombine.low (!%p148_p2), %v194_v7, %v198_v8  ;;  %v1210_v42 = vmov (!%p148_p2), 1966171168   ;;  %v447_v46 = vshrl.u32 (!%p148_p2), %v446_v44, 7 }
   0x9   : > { %251 = vmatprep.subr.bf16.mxu0 (!%p148_p2), %v1059_v3  ;;  %v1065_v14 = vcombine.high (!%p148_p2), %v195_v12, %v199_v13  ;;  %294 = vmatprep.subr.bf16.mxu1 (!%p148_p2), %v1061_v9  ;;  %v1064_v16 = vcombine.low (!%p148_p2), %v195_v12, %v199_v13  ;;  %v444_v43 = vunpack.c.l.s4 (!%p148_p2), %v1210_v42  ;;  %vm970_vm2 = vcmask (!%p148_p2), 130112  }
   0xa   : > { %252 = vmatpush1.bf16.msra.mxu0 (!%p148_p2), %v1058_v5  ;;  %295 = vmatpush1.bf16.msra.mxu1 (!%p148_p2), %v1060_v10 }
   0xb   : > { %337 = vmatprep.subr.bf16.mxu0 (!%p148_p2), %v1063_v11  ;;  %380 = vmatprep.subr.bf16.mxu1 (!%p148_p2), %v1065_v14  ;;  %v445_v45 = vunpack.c.0.s8 (!%p148_p2), %v444_v43 }
   0xd   : > { %s1352_s13 = smov (!%p1249_p3, %s1046_s13), 1  ;;  %v448_v49 = vsub.s32 %v445_v45, %v447_v46 }
   0xe   : > { %s1096_s4 = sshll.u32 %s1352_s13, 3  ;;  %s1097_s5 = sshll.u32 %s1352_s13, 6 }
   0xf   : > { %s180_s8 = scalar_lea.vmem %s1347_s1, %s1096_s4  ;;  %s1282_s11 = scalar_lea.vmem %s1348_s2, %s1097_s5 }
  0x10   : > { %v1183_v17 = vld [vmem:[%s180_s8] sm:$0xff]   ;;  %v1185_v19 = vld [vmem:[%s1282_s11 + $0x8] sm:$0xff]   ;;  %v1186_v20 = vld [vmem:[%s1282_s11 + $0x10] sm:$0xff]   ;;  %s1309_s17 = scalar_lea.vmem %s1349_s3, %s1097_s5  ;;  %s1211_s13 = smov 8  }
  0x11   : > { %v1184_v18 = vld [vmem:[%s1282_s11] sm:$0xff]   ;;  %1066 = vmatmul.mubr.msk.bf16.vlgmr.msra.gmra.mrb[0].mxu0 %vm247_vm0, %v1183_v17  ;;  %1067 = vmatmul.mubr.msk.bf16.vlgmr.msra.gmra.mrb[0].mxu1 %vm247_vm0, %v1183_v17  ;;  %v1187_v21 = vld [vmem:[%s1282_s11 + $0x18] sm:$0xff]   ;;  %v1189_v23 = vld [vmem:[%s1282_s11 + $0x28] sm:$0xff]  }
  0x12   : > { %338 = vmatpush1.bf16.msra.mxu0 %v1062_v15  ;;  %381 = vmatpush1.bf16.msra.mxu1 %v1064_v16  ;;  %v1188_v22 = vld [vmem:[%s1282_s11 + $0x20] sm:$0xff]   ;;  %v1190_v24 = vld [vmem:[%s1282_s11 + $0x30] sm:$0xff]   ;;  %v1191_v25 = vld [vmem:[%s1282_s11 + $0x38] sm:$0xff]  }
  0x13   : > { %369 = vmatprep.mubr.bf16.mxu0 %v1208_v6  ;;  %412 = vmatprep.mubr.bf16.mxu1 %v1208_v6  ;;  %v1192_v26 = vld [vmem:[%s1282_s11] sm:$0xff]   ;;  %v1193_v27 = vld [vmem:[%s1282_s11 + $0x8] sm:$0xff]   ;;  %v1194_v28 = vld [vmem:[%s1282_s11 + $0x10] sm:$0xff]  }
  0x14   : > { %849 = vrot.lane.b32.xlu0 %v1184_v18, %s1209_s14  ;;  %853 = vrot.lane.b32.xlu1 %v1186_v20, %s1209_s14  ;;  %v1195_v29 = vld [vmem:[%s1282_s11 + $0x18] sm:$0xff]   ;;  %v1196_v30 = vld [vmem:[%s1282_s11 + $0x20] sm:$0xff]  }
  0x15   : > { %1123 = vmatprep.subr.bf16.mxu0 %v1192_v26  ;;  %v1197_v31 = vld [vmem:[%s1282_s11 + $0x28] sm:$0xff]   ;;  %v1198_v32 = vld [vmem:[%s1282_s11 + $0x30] sm:$0xff]   ;;  %v1199_v33 = vld [vmem:[%s1282_s11 + $0x38] sm:$0xff]  }
  0x18   : > { %851 = vrot.lane.b32.xlu0 %v1185_v19, %s1209_s14  ;;  %855 = vrot.lane.b32.xlu1 %v1187_v21, %s1209_s14 }
  0x19   : > { %1068 = vmatmul.mubr.msk.bf16.vlgmr.msra.gmra.mrb[4].mxu0 %vm247_vm0, %v1183_v17  ;;  %1069 = vmatmul.mubr.msk.bf16.vlgmr.msra.gmra.mrb[4].mxu1 %vm247_vm0, %v1183_v17 }
  0x1a   : > { %1124 = vmatpush3.bf16.msra.mxu0 %v1192_v26 }
  0x1b   : > { %1125 = vmatprep.subr.bf16.mxu0 %v1193_v27 }
  0x1c   : > { %857 = vrot.lane.b32.xlu0 %v1188_v22, %s1209_s14  ;;  %859 = vrot.lane.b32.xlu1 %v1189_v23, %s1209_s14 }
  0x1e   : > { %1126 = vmatpush3.bf16.msra.mxu0 %v1193_v27 }
  0x1f   : > { %1127 = vmatprep.subr.bf16.mxu0 %v1194_v28 }
  0x20   : > { %861 = vrot.lane.b32.xlu0 %v1190_v24, %s1209_s14  ;;  %863 = vrot.lane.b32.xlu1 %v1191_v25, %s1209_s14 }
  0x22   : > { %1128 = vmatpush3.bf16.msra.mxu0 %v1194_v28 }
  0x23   : > { %1129 = vmatprep.subr.bf16.mxu0 %v1195_v29 }
  0x26   : > { %1130 = vmatpush3.bf16.msra.mxu0 %v1195_v29 }
  0x27   : > { %1131 = vmatprep.subr.bf16.mxu0 %v1196_v30 }
  0x2a   : > { %1132 = vmatpush3.bf16.msra.mxu0 %v1196_v30 }
  0x2b   : > { %1133 = vmatprep.subr.bf16.mxu0 %v1197_v31 }
  0x2e   : > { %1134 = vmatpush3.bf16.msra.mxu0 %v1197_v31 }
  0x2f   : > { %1135 = vmatprep.subr.bf16.mxu0 %v1198_v32 }
  0x32   : > { %1136 = vmatpush3.bf16.msra.mxu0 %v1198_v32 }
  0x33   : > { %1137 = vmatprep.subr.bf16.mxu0 %v1199_v33 }
  0x36   : > { %1138 = vmatpush3.bf16.msra.mxu0 %v1199_v33 }
  0x86   : > { %v850_v34 = vpop.permute.xlu0 %849  ;;  %v854_v35 = vpop.permute.xlu1 %853 }
  0x87   : > { %1147 = vmatprep.subr.bf16.mxu1 %v850_v34 }
  0x88   : > { %1148 = vmatpush3.bf16.msra.mxu1 %v850_v34 }
  0x8a   : > { %v852_v36 = vpop.permute.xlu0 %851  ;;  %v856_v37 = vpop.permute.xlu1 %855 }
  0x8b   : > { %1149 = vmatprep.subr.bf16.mxu1 %v852_v36 }
  0x8c   : > { %1150 = vmatpush3.bf16.msra.mxu1 %v852_v36 }
  0x8d   : > { %1151 = vmatprep.subr.bf16.mxu1 %v854_v35 }
  0x8e   : > { %v858_v38 = vpop.permute.xlu0 %857  ;;  %v860_v39 = vpop.permute.xlu1 %859 }
  0x90   : > { %1152 = vmatpush3.bf16.msra.mxu1 %v854_v35 }
  0x91   : > { %1153 = vmatprep.subr.bf16.mxu1 %v856_v37 }
  0x92   : > { %v862_v40 = vpop.permute.xlu0 %861  ;;  %v864_v41 = vpop.permute.xlu1 %863 }
  0x94   : > { %1154 = vmatpush3.bf16.msra.mxu1 %v856_v37 }
  0x95   : > { %1155 = vmatprep.subr.bf16.mxu1 %v858_v38 }
  0x98   : > { %1156 = vmatpush3.bf16.msra.mxu1 %v858_v38 }
  0x99   : > { %1157 = vmatprep.subr.bf16.mxu1 %v860_v39 }
  0x9c   : > { %1158 = vmatpush3.bf16.msra.mxu1 %v860_v39 }
  0x9d   : > { %1159 = vmatprep.subr.bf16.mxu1 %v862_v40 }
  0xa0   : > { %1160 = vmatpush3.bf16.msra.mxu1 %v862_v40 }
  0xa1   : > { %1161 = vmatprep.subr.bf16.mxu1 %v864_v41 }
  0xa4   : > { %1162 = vmatpush3.bf16.msra.mxu1 %v864_v41 }
  0xe4   : > { %v285_v47 = vpop.f32.mrb[0].mxu0  ;;  %v328_v48 = vpop.f32.mrb[0].mxu1 }
  0xe5   : > { %v287_v50 = vpop.f32.mrb[1].mxu0  ;;  %v330_v51 = vpop.f32.mrb[1].mxu1 }
  0xe6   : > { %v1070_v52 = vpack.c.bf16 %v287_v50, %v285_v47  ;;  %v1071_v53 = vpack.c.bf16 %v330_v51, %v328_v48  ;;  %v289_v54 = vpop.f32.mrb[2].mxu0  ;;  %v332_v55 = vpop.f32.mrb[2].mxu1 }
  0xe7   : > { %v291_v56 = vpop.f32.mrb[3].mxu0  ;;  %v334_v57 = vpop.f32.mrb[3].mxu1 }
  0xe8   : > { %v449_v58 = vrot.slane %v1070_v52, %v448_v49  ;;  %v456_v59 = vrot.slane %v1071_v53, %v448_v49  ;;  %v1082_v60 = vpack.c.bf16 %v291_v56, %v289_v54  ;;  %v1083_v61 = vpack.c.bf16 %v334_v57, %v332_v55 }
  0xea   : > { %v471_v62 = vcombine.low %v449_v58, %v456_v59  ;;  %v472_v63 = vcombine.high %v449_v58, %v456_v59  ;;  %v695_v0 = vrot.slane %v1082_v60, %v448_v49  ;;  %v702_v1 = vrot.slane %v1083_v61, %v448_v49 }
  0xec   : > { %v717_v2 = vcombine.low %v695_v0, %v702_v1  ;;  %v718_v3 = vcombine.high %v695_v0, %v702_v1  ;;  %v371_v4 = vpop.f32.mrb[4].mxu0  ;;  %v414_v5 = vpop.f32.mrb[4].mxu1  ;;  %v481_v22 = vrot.slane %v471_v62, %v448_v49  ;;  %v488_v23 = vrot.slane %v472_v63, %v448_v49 }
  0xed   : > { %v373_v6 = vpop.f32.mrb[5].mxu0  ;;  %v416_v7 = vpop.f32.mrb[5].mxu1 }
  0xee   : > { %v1072_v8 = vpack.c.bf16 %v373_v6, %v371_v4  ;;  %v1073_v9 = vpack.c.bf16 %v416_v7, %v414_v5  ;;  %v375_v10 = vpop.f32.mrb[6].mxu0  ;;  %v418_v11 = vpop.f32.mrb[6].mxu1  ;;  %v727_v32 = vrot.slane %v717_v2, %v448_v49  ;;  %v734_v33 = vrot.slane %v718_v3, %v448_v49 }
  0xef   : > { %v377_v12 = vpop.f32.mrb[7].mxu0  ;;  %v420_v13 = vpop.f32.mrb[7].mxu1 }
  0xf0   : > { %v463_v14 = vrot.slane %v1072_v8, %v448_v49  ;;  %v470_v15 = vrot.slane %v1073_v9, %v448_v49  ;;  %v1084_v16 = vpack.c.bf16 %v377_v12, %v375_v10  ;;  %v1085_v17 = vpack.c.bf16 %v420_v13, %v418_v11 }
  0xf2   : > { %v473_v18 = vcombine.low %v463_v14, %v470_v15  ;;  %v474_v19 = vcombine.high %v463_v14, %v470_v15  ;;  %v709_v20 = vrot.slane %v1084_v16, %v448_v49  ;;  %v716_v21 = vrot.slane %v1085_v17, %v448_v49 }
  0xf4   : > { %v495_v24 = vrot.slane %v473_v18, %v448_v49  ;;  %v502_v25 = vrot.slane %v474_v19, %v448_v49  ;;  %v719_v26 = vcombine.low %v709_v20, %v716_v21  ;;  %v720_v27 = vcombine.high %v709_v20, %v716_v21 }
  0xf6   : > { %v503_v28 = vcombine.low %v481_v22, %v495_v24  ;;  %v504_v29 = vcombine.high %v481_v22, %v495_v24  ;;  %v505_v30 = vcombine.low %v488_v23, %v502_v25  ;;  %v506_v31 = vcombine.high %v488_v23, %v502_v25 }
  0xf7   : > { %v741_v34 = vrot.slane %v719_v26, %v448_v49  ;;  %v748_v35 = vrot.slane %v720_v27, %v448_v49 }
  0xf8   : > { %v507_v36 = vunpack.c.l.b16 %v503_v28  ;;  %v508_v37 = vunpack.c.h.b16 %v503_v28  ;;  %v517_v38 = vunpack.c.l.b16 %v505_v30  ;;  %v518_v39 = vunpack.c.h.b16 %v505_v30 }
  0xf9   : > { %v527_v40 = vunpack.c.l.b16 %v504_v29  ;;  %v528_v41 = vunpack.c.h.b16 %v504_v29  ;;  %v537_v42 = vunpack.c.l.b16 %v506_v31  ;;  %v538_v43 = vunpack.c.h.b16 %v506_v31 }
  0xfa   : > { %v519_v44 = vpack.i.b16 %v518_v39, %v517_v38  ;;  %v749_v45 = vcombine.low %v727_v32, %v741_v34  ;;  %v750_v46 = vcombine.high %v727_v32, %v741_v34  ;;  %v751_v47 = vcombine.low %v734_v33, %v748_v35 }
  0xfb   : > { %v752_v48 = vcombine.high %v734_v33, %v748_v35  ;;  %v509_v50 = vpack.i.b16 %v508_v37, %v507_v36  ;;  %v529_v51 = vpack.i.b16 %v528_v41, %v527_v40  ;;  %v539_v52 = vpack.i.b16 %v538_v43, %v537_v42 }
  0xfc   : > { %v753_v53 = vunpack.c.l.b16 %v749_v45  ;;  %v754_v54 = vunpack.c.h.b16 %v749_v45  ;;  %v763_v55 = vunpack.c.l.b16 %v751_v47  ;;  %v764_v49 = vunpack.c.h.b16 %v751_v47 }
  0xfd   : > { %v773_v56 = vunpack.c.l.b16 %v750_v46  ;;  %v774_v57 = vunpack.c.h.b16 %v750_v46  ;;  %v783_v58 = vunpack.c.l.b16 %v752_v48  ;;  %v784_v59 = vunpack.c.h.b16 %v752_v48 }
  0xfe   : > { %v765_v60 = vpack.i.b16 %v764_v49, %v763_v55  ;;  %v510_v61 = vunpack.c.l.b16 %v509_v50  ;;  %v511_v62 = vunpack.c.h.b16 %v509_v50  ;;  %v520_v63 = vunpack.c.l.b16 %v519_v44 }
  0xff   : > { %v521_v0 = vunpack.c.h.b16 %v519_v44  ;;  %v530_v1 = vunpack.c.l.b16 %v529_v51  ;;  %v531_v2 = vunpack.c.h.b16 %v529_v51  ;;  %v755_v3 = vpack.i.b16 %v754_v54, %v753_v53 }
 0x100   : > { %v512_v4 = vpack.i.b16 %v511_v62, %v510_v61  ;;  %v766_v5 = vunpack.c.l.b16 %v765_v60  ;;  %v767_v6 = vunpack.c.h.b16 %v765_v60  ;;  %v775_v7 = vpack.i.b16 %v774_v57, %v773_v56 }
 0x101   : > { %v522_v8 = vpack.i.b16 %v521_v0, %v520_v63  ;;  %v532_v9 = vpack.i.b16 %v531_v2, %v530_v1  ;;  %v756_v10 = vunpack.c.l.b16 %v755_v3  ;;  %v757_v11 = vunpack.c.h.b16 %v755_v3 }
 0x102   : > { %v513_v12 = vunpack.c.l.b16 %v512_v4  ;;  %v514_v13 = vunpack.c.h.b16 %v512_v4  ;;  %v768_v14 = vpack.i.b16 %v767_v6, %v766_v5  ;;  %v776_v15 = vunpack.c.l.b16 %v775_v7 }
 0x103   : > { %v523_v16 = vunpack.c.l.b16 %v522_v8  ;;  %v524_v17 = vunpack.c.h.b16 %v522_v8  ;;  %v533_v18 = vunpack.c.l.b16 %v532_v9  ;;  %v534_v19 = vunpack.c.h.b16 %v532_v9 }
 0x104   : > { %v515_v20 = vpack.i.b16 %v514_v13, %v513_v12  ;;  %v758_v21 = vpack.i.b16 %v757_v11, %v756_v10  ;;  %v769_v22 = vunpack.c.l.b16 %v768_v14  ;;  %v770_v23 = vunpack.c.h.b16 %v768_v14 }
 0x105   : > { %v525_v24 = vpack.i.b16 %v524_v17, %v523_v16  ;;  %v777_v25 = vunpack.c.h.b16 %v775_v7  ;;  %v540_v26 = vunpack.c.l.b16 %v539_v52  ;;  %v535_v27 = vpack.i.b16 %v534_v19, %v533_v18 }
 0x106   : > { %1139 = vmatprep.mubr.bf16.mxu0 %v515_v20  ;;  %v759_v28 = vunpack.c.l.b16 %v758_v21  ;;  %v760_v29 = vunpack.c.h.b16 %v758_v21  ;;  %v541_v30 = vunpack.c.h.b16 %v539_v52  ;;  %v771_v31 = vpack.i.b16 %v770_v23, %v769_v22 }
 0x107   : > { %1140 = vmatmul.mubr.bf16.vlgmr.msra.gmra.mrb[8].mxu0 %v525_v24  ;;  %v778_v32 = vpack.i.b16 %v777_v25, %v776_v15  ;;  %v785_v33 = vpack.i.b16 %v784_v59, %v783_v58 }
 0x108   : > { %1143 = vmatprep.mubr.bf16.mxu0 %v535_v27  ;;  %v761_v34 = vpack.i.b16 %v760_v29, %v759_v28  ;;  %v542_v35 = vpack.i.b16 %v541_v30, %v540_v26 }
 0x109   : > { %v779_v36 = vunpack.c.l.b16 %v778_v32  ;;  %v780_v37 = vunpack.c.h.b16 %v778_v32  ;;  %v786_v38 = vunpack.c.l.b16 %v785_v33  ;;  %v787_v39 = vunpack.c.h.b16 %v785_v33 }
 0x10a   : > { %1163 = vmatprep.mubr.bf16.mxu1 %v761_v34  ;;  %v543_v40 = vunpack.c.l.b16 %v542_v35  ;;  %v544_v41 = vunpack.c.h.b16 %v542_v35 }
 0x10b   : > { %1164 = vmatmul.mubr.bf16.vlgmr.msra.gmra.mrb[8].mxu1 %v771_v31  ;;  %v781_v42 = vpack.i.b16 %v780_v37, %v779_v36  ;;  %v788_v43 = vpack.i.b16 %v787_v39, %v786_v38 }
 0x10c   : > { %v545_v44 = vpack.i.b16 %v544_v41, %v543_v40 }
 0x10d   : > { %1167 = vmatprep.mubr.bf16.mxu1 %v781_v42  ;;  %v789_v45 = vunpack.c.l.b16 %v788_v43  ;;  %v790_v46 = vunpack.c.h.b16 %v788_v43 }
 0x10f   : > { %1144 = vmatmul.mubr.bf16.gmra.mrb[12].mxu0 %v545_v44  ;;  %v791_v47 = vpack.i.b16 %v790_v46, %v789_v45 }
 0x113   : > { %1168 = vmatmul.mubr.bf16.gmra.mrb[12].mxu1 %v791_v47 }
 0x1da   : > { %v1141_v48 = vpop.f32.mrb[8].mxu0 }
 0x1db   : > { %679 = vst.msk [vmem:[%s1309_s17 + $0x10] sm:$0xff] %vm676_vm1, %v1141_v48  ;;  %v645_v50 = vpop.f32.mrb[9].mxu0 }
 0x1dc   : > { %677 = vst.msk [vmem:[%s1309_s17] sm:$0xff] %vm676_vm1, %v645_v50  ;;  %v1142_v51 = vpop.f32.mrb[10].mxu0 }
 0x1dd   : > { %680 = vst.msk [vmem:[%s1309_s17 + $0x18] sm:$0xff] %vm676_vm1, %v1142_v51  ;;  %v648_v52 = vpop.f32.mrb[11].mxu0 }
 0x1de   : > { %v1165_v53 = vpop.f32.mrb[8].mxu1  ;;  %678 = vst.msk [vmem:[%s1309_s17 + $0x8] sm:$0xff] %vm676_vm1, %v648_v52 }
 0x1df   : > { %950 = vrot.lane.b32.xlu0 %v1165_v53, %s1211_s13  ;;  %v907_v54 = vpop.f32.mrb[9].mxu1 }
 0x1e0   : > { %v1166_v55 = vpop.f32.mrb[10].mxu1 }
 0x1e1   : > { %952 = vrot.lane.b32.xlu1 %v1166_v55, %s1211_s13  ;;  %v910_v49 = vpop.f32.mrb[11].mxu1 }
 0x1e2   : > { %v1145_v56 = vpop.f32.mrb[12].mxu0 }
 0x1e3   : > { %946 = vrot.lane.b32.xlu0 %v907_v54, %s1211_s13  ;;  %683 = vst.msk [vmem:[%s1309_s17 + $0x30] sm:$0xff] %vm676_vm1, %v1145_v56  ;;  %v661_v57 = vpop.f32.mrb[13].mxu0 }
 0x1e4   : > { %681 = vst.msk [vmem:[%s1309_s17 + $0x20] sm:$0xff] %vm676_vm1, %v661_v57  ;;  %v1146_v58 = vpop.f32.mrb[14].mxu0 }
 0x1e5   : > { %948 = vrot.lane.b32.xlu1 %v910_v49, %s1211_s13  ;;  %684 = vst.msk [vmem:[%s1309_s17 + $0x38] sm:$0xff] %vm676_vm1, %v1146_v58  ;;  %v664_v59 = vpop.f32.mrb[15].mxu0 }
 0x1e6   : > { %v1169_v60 = vpop.f32.mrb[12].mxu1  ;;  %682 = vst.msk [vmem:[%s1309_s17 + $0x28] sm:$0xff] %vm676_vm1, %v664_v59 }
 0x1e7   : > { %v923_v61 = vpop.f32.mrb[13].mxu1 }
 0x1e8   : > { %954 = vrot.lane.b32.xlu0 %v923_v61, %s1211_s13  ;;  %v1170_v62 = vpop.f32.mrb[14].mxu1 }
 0x1e9   : > { %v926_v63 = vpop.f32.mrb[15].mxu1 }
 0x1ea   : > { %956 = vrot.lane.b32.xlu1 %v926_v63, %s1211_s13 }
 0x1ec   : > { %958 = vrot.lane.b32.xlu0 %v1169_v60, %s1211_s13 }
 0x1ee   : > { %960 = vrot.lane.b32.xlu1 %v1170_v62, %s1211_s13 }
 0x251   : > { %v951_v0 = vpop.permute.xlu0 %950 }
 0x252   : > { %973 = vst.msk [vmem:[%s1309_s17 + $0x10] sm:$0xff] %vm970_vm2, %v951_v0 }
 0x253   : > { %v953_v1 = vpop.permute.xlu1 %952 }
 0x254   : > { %974 = vst.msk [vmem:[%s1309_s17 + $0x18] sm:$0xff] %vm970_vm2, %v953_v1 }
 0x255   : > { %v947_v2 = vpop.permute.xlu0 %946 }
 0x256   : > { %971 = vst.msk [vmem:[%s1309_s17] sm:$0xff] %vm970_vm2, %v947_v2 }
 0x257   : > { %v949_v3 = vpop.permute.xlu1 %948 }
 0x258   : > { %972 = vst.msk [vmem:[%s1309_s17 + $0x8] sm:$0xff] %vm970_vm2, %v949_v3 }
 0x25a   : > { %v955_v4 = vpop.permute.xlu0 %954 }
 0x25b   : > { %975 = vst.msk [vmem:[%s1309_s17 + $0x20] sm:$0xff] %vm970_vm2, %v955_v4 }
 0x25c   : > { %v957_v5 = vpop.permute.xlu1 %956 }
 0x25d   : > { %976 = vst.msk [vmem:[%s1309_s17 + $0x28] sm:$0xff] %vm970_vm2, %v957_v5 }
 0x25e   : > { %v959_v6 = vpop.permute.xlu0 %958 }
 0x25f   : > { %977 = vst.msk [vmem:[%s1309_s17 + $0x30] sm:$0xff] %vm970_vm2, %v959_v6 }
 0x260   : > { %v961_v7 = vpop.permute.xlu1 %960 }
 0x261   : > { %978 = vst.msk [vmem:[%s1309_s17 + $0x38] sm:$0xff] %vm970_vm2, %v961_v7 }
 0x262 PF: > { %s13_s12 = sadd.s32 1, %s1206_s12  }
 0x263   : > { %p10_p4 = scmp.ge.s32.totalorder %s13_s12, 4  }
 0x265   :  { %12 = sbr.rel (!%p10_p4) target bundleno = 1 (0x1), region = 65 }

</bundles_post_ra>
